<compile_context>
chip_gen: v5e
topology: v5e:2x2
jax: 0.10.0
libtpu: 0.0.40
codegen_flags: <defaults>
</compile_context>

<pallas_src>
import functools
import math

import jax
import jax.numpy as jnp
import numpy as np
from jax import lax
from jax.experimental import pallas as pl
from jax.experimental.pallas import tpu as pltpu

# Large negative finite value (same trick as the reference flash-attention
# kernel) — produces exactly-zero probabilities after softmax, like -inf.
_MASK_VALUE = -0.7 * float(np.finfo(np.float32).max)


def _attn_kernel(q_ref, k_ref, v_ref, o_ref, *, mask_flag: bool):
    # q_ref / k_ref: (G, L, E);  v_ref / o_ref: (G, L, D)
    q = q_ref[...]
    k = k_ref[...]
    v = v_ref[...]
    e = q.shape[-1]
    scale = 1.0 / math.sqrt(e)

    # (G, L, L) scores on the MXU with f32 accumulation.
    scores = jnp.einsum("gle,gme->glm", q, k,
                        preferred_element_type=jnp.float32) * scale

    if mask_flag:
        l = scores.shape[-1]
        row = lax.broadcasted_iota(jnp.int32, (l, l), 0)
        col = lax.broadcasted_iota(jnp.int32, (l, l), 1)
        keep = (col <= row)[None, :, :]          # mask strict upper triangle
        scores = jnp.where(keep, scores, _MASK_VALUE)

    # Numerically stable softmax over the key axis.
    m = jnp.max(scores, axis=-1, keepdims=True)
    p = jnp.exp(scores - m)
    denom = jnp.sum(p, axis=-1, keepdims=True)
    attn = p / denom
    # TODO(synk): nn.Dropout(0.1) on the attention map is identity in eval
    # mode; training-mode dropout (torch RNG stream) is not replicated here.

    out = jnp.einsum("glm,gmd->gld", attn.astype(v.dtype), v,
                     preferred_element_type=jnp.float32)
    o_ref[...] = out.astype(o_ref.dtype)


def _planes_per_step(bh: int, l: int, e: int, d: int,
                     vmem_budget_bytes: int = 8 << 20) -> int:
    """How many (batch*head) planes to process per grid step."""
    # f32 VMEM bytes per plane for q, k, v, o, double-buffered by the pipeline.
    per_plane = 4 * (2 * l * e + 2 * l * d) * 2
    max_g = max(1, vmem_budget_bytes // max(per_plane, 1))
    divisors = [g for g in range(bh, 0, -1) if bh % g == 0]
    # Prefer a grid of length >= 2 so v7x's two TensorCores both get work.
    for g in divisors:
        if g <= max_g and bh // g >= 2:
            return g
    for g in divisors:
        if g <= max_g:
            return g
    return 1


def full_attention_forward(queries, keys, values, *, mask_flag=True,
                           output_attention=False):
    """Pallas implementation of Full_Attention.forward. Returns (out, attn)."""
    B, L, H, E = queries.shape
    D = values.shape[-1]
    BH = B * H

    # (B, L, H, X) -> (B*H, L, X); keep the original dtype (no wrapper cast).
    q = jnp.transpose(queries, (0, 2, 1, 3)).reshape(BH, L, E)
    k = jnp.transpose(keys, (0, 2, 1, 3)).reshape(BH, L, E)
    v = jnp.transpose(values, (0, 2, 1, 3)).reshape(BH, L, D)

    G = _planes_per_step(BH, L, E, D)
    grid = (BH // G,)

    cost = pl.CostEstimate(
        flops=2 * BH * L * L * (E + D),
        transcendentals=BH * L * L,
        bytes_accessed=4 * BH * L * (2 * E + 2 * D),
    )

    out = pl.pallas_call(
        functools.partial(_attn_kernel, mask_flag=mask_flag),
        out_shape=jax.ShapeDtypeStruct((BH, L, D), queries.dtype),
        grid_spec=pltpu.PrefetchScalarGridSpec(
            num_scalar_prefetch=0,
            grid=grid,
            in_specs=[
                pl.BlockSpec((G, L, E), lambda i: (i, 0, 0)),   # Q block
                pl.BlockSpec((G, L, E), lambda i: (i, 0, 0)),   # K block
                pl.BlockSpec((G, L, D), lambda i: (i, 0, 0)),   # V block
            ],
            out_specs=pl.BlockSpec((G, L, D), lambda i: (i, 0, 0)),
        ),
        compiler_params=pltpu.CompilerParams(
            dimension_semantics=("parallel",)),
        cost_estimate=cost,
    )(q, k, v)

    out = out.reshape(B, H, L, D).transpose(0, 2, 1, 3)
    # TODO(synk): output_attention=True (returning the (B,H,L,L) map) is not
    # wired as a second Pallas output; default module config returns None.
    return out, None


def _reference(queries, keys, values, mask_flag=True):
    """Pure-JAX reference matching the PyTorch forward (eval mode)."""
    B, L, H, E = queries.shape
    scale = 1.0 / math.sqrt(E)
    qh = jnp.transpose(queries, (0, 2, 1, 3))          # (B, H, L, E)
    kh = jnp.transpose(keys, (0, 2, 3, 1))             # (B, H, E, L)
    scores = jnp.matmul(qh, kh) * scale                # (B, H, L, L)
    if mask_flag:
        causal = jnp.triu(jnp.ones((L, L), dtype=bool), k=1)
        scores = jnp.where(causal[None, None], -jnp.inf, scores)
    attn = jax.nn.softmax(scores, axis=-1)
    vh = jnp.transpose(values, (0, 2, 1, 3))           # (B, H, L, D)
    out = jnp.matmul(attn, vh)                         # (B, H, L, D)
    return jnp.transpose(out, (0, 2, 1, 3))            # (B, L, H, D)


if __name__ == "__main__":
    key = jax.random.PRNGKey(0)
    B, L, H, E, D = 2, 16, 4, 32, 32
    kq, kk, kv = jax.random.split(key, 3)
    q = jax.random.normal(kq, (B, L, H, E), dtype=jnp.float32)
    k = jax.random.normal(kk, (B, L, H, E), dtype=jnp.float32)
    v = jax.random.normal(kv, (B, L, H, D), dtype=jnp.float32)

    out, attn = full_attention_forward(q, k, v)
    out = jax.block_until_ready(out)

    ref = _reference(q, k, v)
    np.testing.assert_allclose(np.asarray(out), np.asarray(ref),
                               rtol=1e-3, atol=1e-3)
    assert attn is None

    print("KERNEL_OK")
</pallas_src>

<mosaic_0001>
module attributes {stable_mosaic.version = 11 : i64} {
  func.func @_attn_kernel(%arg0: i32, %arg1: memref<4x16x32xf32, #tpu.memory_space<vmem>>, %arg2: memref<4x16x32xf32, #tpu.memory_space<vmem>>, %arg3: memref<4x16x32xf32, #tpu.memory_space<vmem>>, %arg4: memref<4x16x32xf32, #tpu.memory_space<vmem>>) attributes {dimension_semantics = [#tpu.dimension_semantics<parallel>], iteration_bounds = array<i64: 2>, scalar_prefetch = 0 : i64, scratch_operands = 0 : i64, tpu.core_type = #tpu.core_type<tc>, window_params = [{transform_indices = @transform_0, window_bounds = array<i64: 4, 16, 32>}, {transform_indices = @transform_1, window_bounds = array<i64: 4, 16, 32>}, {transform_indices = @transform_2, window_bounds = array<i64: 4, 16, 32>}, {transform_indices = @transform_3, window_bounds = array<i64: 4, 16, 32>}]} {
    %c0 = arith.constant 0 : index
    %c0_0 = arith.constant 0 : index
    %c0_1 = arith.constant 0 : index
    %0 = vector.load %arg1[%c0, %c0_0, %c0_1] : memref<4x16x32xf32, #tpu.memory_space<vmem>>, vector<4x16x32xf32>
    %c0_2 = arith.constant 0 : index
    %c0_3 = arith.constant 0 : index
    %c0_4 = arith.constant 0 : index
    %1 = vector.load %arg2[%c0_2, %c0_3, %c0_4] : memref<4x16x32xf32, #tpu.memory_space<vmem>>, vector<4x16x32xf32>
    %c0_5 = arith.constant 0 : index
    %c0_6 = arith.constant 0 : index
    %c0_7 = arith.constant 0 : index
    %2 = vector.load %arg3[%c0_5, %c0_6, %c0_7] : memref<4x16x32xf32, #tpu.memory_space<vmem>>, vector<4x16x32xf32>
    "tpu.trace_start"() <{level = 10 : i32, message = "gle,gme->glm"}> : () -> ()
    %cst = arith.constant dense<0.000000e+00> : vector<4x16x16xf32>
    %3 = tpu.matmul %0, %1, %cst {dimension_numbers = #tpu.dot_dimension_numbers<[2], [2], [1], [1], [0, 0, 0, 1, 1, 1], [0], [0]>} : vector<4x16x32xf32>, vector<4x16x32xf32>, vector<4x16x16xf32> -> vector<4x16x16xf32>
    "tpu.trace_stop"() : () -> ()
    %cst_8 = arith.constant 0.176776692 : f32
    %4 = vector.broadcast %cst_8 : f32 to vector<4x16x16xf32>
    %5 = arith.mulf %3, %4 : vector<4x16x16xf32>
    %6 = tpu.iota {dimensions = array<i32: 0>} : vector<16x16xi32>
    %7 = tpu.iota {dimensions = array<i32: 1>} : vector<16x16xi32>
    %8 = arith.cmpi sle, %7, %6 : vector<16x16xi32>
    %9 = vector.shape_cast %8 : vector<16x16xi1> to vector<1x16x16xi1>
    %cst_9 = arith.constant -2.38197633E+38 : f32
    %10 = vector.shape_cast %9 : vector<1x16x16xi1> to vector<1x16x16xi1>
    %11 = vector.broadcast %10 : vector<1x16x16xi1> to vector<4x16x16xi1>
    %12 = vector.broadcast %cst_9 : f32 to vector<4x16x16xf32>
    %13 = arith.select %11, %5, %12 : vector<4x16x16xi1>, vector<4x16x16xf32>
    %cst_10 = arith.constant dense<0xFF800000> : vector<4x16xf32>
    %14 = vector.multi_reduction <maximumf>, %13, %cst_10 [2] : vector<4x16x16xf32> to vector<4x16xf32>
    %15 = vector.shape_cast %14 : vector<4x16xf32> to vector<4x16x1xf32>
    %16 = vector.broadcast %15 : vector<4x16x1xf32> to vector<4x16x16xf32>
    %17 = arith.subf %13, %16 : vector<4x16x16xf32>
    %18 = math.exp %17 : vector<4x16x16xf32>
    %cst_11 = arith.constant dense<0.000000e+00> : vector<4x16xf32>
    %19 = vector.multi_reduction <add>, %18, %cst_11 [2] : vector<4x16x16xf32> to vector<4x16xf32>
    %20 = vector.shape_cast %19 : vector<4x16xf32> to vector<4x16x1xf32>
    %21 = vector.broadcast %20 : vector<4x16x1xf32> to vector<4x16x16xf32>
    %22 = arith.divf %18, %21 : vector<4x16x16xf32>
    "tpu.trace_start"() <{level = 10 : i32, message = "glm,gmd->gld"}> : () -> ()
    %cst_12 = arith.constant dense<0.000000e+00> : vector<4x16x32xf32>
    %23 = tpu.matmul %22, %2, %cst_12 {dimension_numbers = #tpu.dot_dimension_numbers<[2], [1], [1], [2], [0, 0, 0, 1, 1, 2], [0], [0]>} : vector<4x16x16xf32>, vector<4x16x32xf32>, vector<4x16x32xf32> -> vector<4x16x32xf32>
    "tpu.trace_stop"() : () -> ()
    %c0_13 = arith.constant 0 : index
    %c0_14 = arith.constant 0 : index
    %c0_15 = arith.constant 0 : index
    %24 = vector.load %arg4[%c0_13, %c0_14, %c0_15] : memref<4x16x32xf32, #tpu.memory_space<vmem>>, vector<4x16x32xf32>
    tpu.vector_store %arg4[%c0_13, %c0_14, %c0_15], %23 {strides = array<i32>} : memref<4x16x32xf32, #tpu.memory_space<vmem>>, vector<4x16x32xf32>,
    return
  }
  func.func @transform_0(%arg0: i32) -> (i32, i32, i32) {
    %c0_i32 = arith.constant 0 : i32
    %c0_i32_0 = arith.constant 0 : i32
    %c0_i32_1 = arith.constant 0 : i32
    return %arg0, %c0_i32, %c0_i32_0 : i32, i32, i32
  }
  func.func @transform_1(%arg0: i32) -> (i32, i32, i32) {
    %c0_i32 = arith.constant 0 : i32
    %c0_i32_0 = arith.constant 0 : i32
    %c0_i32_1 = arith.constant 0 : i32
    return %arg0, %c0_i32, %c0_i32_0 : i32, i32, i32
  }
  func.func @transform_2(%arg0: i32) -> (i32, i32, i32) {
    %c0_i32 = arith.constant 0 : i32
    %c0_i32_0 = arith.constant 0 : i32
    %c0_i32_1 = arith.constant 0 : i32
    return %arg0, %c0_i32, %c0_i32_0 : i32, i32, i32
  }
  func.func @transform_3(%arg0: i32) -> (i32, i32, i32) {
    %c0_i32 = arith.constant 0 : i32
    %c0_i32_0 = arith.constant 0 : i32
    %c0_i32_1 = arith.constant 0 : i32
    return %arg0, %c0_i32, %c0_i32_0 : i32, i32, i32
  }
}

</mosaic_0001>

<bundles_post_ra>
// kernel: tpu_custom_call.1
= control target key start
LH: loop header
LB: loop body
LE: loop exit
PB: predicated region body
PF: predicated region fallthrough
CT: control target
= control target key end

     0   :  { %s1620_s0 = inlined_call_operand.hbm [shape: f32[8,16,32], index: 0, kind: input, shape index: {}]   ;;  %s1621_s1 = inlined_call_operand.hbm [shape: f32[8,16,32], index: 1, kind: input, shape index: {}]   ;;  %s1622_s2 = inlined_call_operand.hbm [shape: f32[8,16,32], index: 2, kind: input, shape index: {}]   ;;  %s1623_s3 = inlined_call_operand.hbm [shape: f32[8,16,32], index: 3, kind: output, shape index: {}]  }
   0x1   :  { %1626 = sst [smem:[#allocation13_spill]] %s1620_s0 }
   0x2   :  { %1627 = sst [smem:[#allocation14_spill]] %s1621_s1 }
   0x3   :  { %8 = vsyncpa [#allocation3], 0 }
   0x4   :  { %10 = vsyncpa [#allocation3 + $0x1], 0 }
   0x5   :  { %11 = vsyncpa [#allocation6], 0 }
   0x6   :  { %13 = vsyncpa [#allocation6 + $0x1], 0 }
   0x7   :  { %14 = vsyncpa [#allocation4], 0 }
   0x8   :  { %16 = vsyncpa [#allocation4 + $0x1], 0  ;;  %s1257_s12 = smov 0   ;;  %s1259_s13 = smov 0  }
   0x9   :  { %s1261_s14 = smov 0   ;;  %s1263_s15 = smov 0  }
   0xa LB: > { %s1278_s16 = sadd.s32 4294967295, %s1231_s15   ;;  %s921_s17 = sadd.s32 4294967294, %s1231_s15   ;;  %s1231_s15 = sphi %s1263_s15, %s1651_s15   ;;  %s1227_s14 = sphi %s1261_s14, %s1650_s14   ;;  %s1223_s13 = sphi %s1259_s13, %s1649_s13   ;;  %s1219_s12 = sphi %s1257_s12, %s1648_s12  }
   0xb   : > { %s1282_s18 = sadd.s32 1, %s1231_s15   ;;  %s29_s19 = sadd.s32 1, %s1227_s14 }
   0xc   : > { %s26_s20 = ssub.s32 %s1231_s15, %s1282_s18  ;;  %p36_p0 = scmp.ne.s32.totalorder %s1227_s14, %s1223_s13 }
   0xd   : > { %p27_p1 = scmp.eq.s32.totalorder %s26_s20, 0  ;;  %p37_p2 = scmp.eq.s32.totalorder %s1231_s15, 0 }
   0xe   : > { %p42_p3 = scmp.ne.s32.totalorder %s1223_s13, %s1219_s12  ;;  %p43_p4 = scmp.eq.s32.totalorder %s1278_s16, 0 }
   0xf   : > { %s1294_s21 = scalar_select %p27_p1, %s1227_s14, %s29_s19  }
  0x10   : > { %p38_p5 = por %p37_p2, %p36_p0  ;;  %p1296_p6 = por %p43_p4, %p42_p3 }
  0x11   : > { %1628 = sst [smem:[#allocation12_spill]] %s1294_s21  ;;  %p118_p7 = scmp.eq.s32.totalorder %s1278_s16, 1 }
  0x12   : > { %p124_p8 = scmp.eq.s32.totalorder %s921_s17, 1  ;;  %p923_p9 = scmp.ge.s32.totalorder %s1231_s15, 2 }
  0x13   : > { %p1001_p10 = scmp.lt.s32.totalorder %s1231_s15, 2  ;;  %p1303_p11 = por %p118_p7, %p36_p0 }
  0x14   : > { %p1307_p12 = por %p124_p8, %p42_p3  ;;  %s144_s25 = sand.u32 1, %s1227_s14  }
  0x15   : > { %s1313_s26 = sshll.u32 %s1231_s15, 6  ;;  %s1317_s27 = sshll.u32 %s144_s25, 6 }
  0x16   : > { %p1319_p13 = pnand %p1001_p10, %p38_p5  ;;  %s167_s29 = sand.u32 1, %s1231_s15  }
  0x17   : > { %s1633_s1 = sld [smem:[#allocation14_spill]]  ;;  %s171_s6 = scalar_lea.vmem [#allocation5], %s1317_s27 }
  0x18   : > { %s180_s7 = sshll.u32 %s171_s6, 4  ;;  %p936_p0 = scmp.ge.s32.totalorder %s1231_s15, 1  ;;  %s181_s7 = int_to_ptr.vmem [resolvable:$true] %s180_s7 }
  0x19   : > { %s1330_s9 = scalar_lea.sflag [#allocation6], %s167_s29  ;;  %p1075_p2 = pneg %p1319_p13 }
  0x1d   : > { %s177_s5 = scalar_lea.hbm %s1633_s1, %s1313_s26  ;;  %s1078_s20 = scalar_lea.hbm %s1633_s1, 128 }
  0x1e   : > { %s178_s8 = sshll.u32 %s177_s5, 4  ;;  %s179_s8 = int_to_ptr.hbm [resolvable:$true] %s178_s8 }
  0x1f   : > { %s1071_s10 = sshra.s32 %s179_s8, 4  ;;  %s1072_s10 = int_to_ptr.hbm [resolvable:$true] %s1071_s10 }
  0x20   : > { %s1073_s11 = scalar_lea.hbm %s1072_s10, 64  ;;  %p1079_p5 = scmp.lt.s32.totalorder %s1072_s10, %s1633_s1 }
  0x21   : > { %p1074_p1 = scmp.ne.s32.totalorder %s1072_s10, %s1073_s11  ;;  %p1080_p7 = scmp.lt.s32.totalorder %s1078_s20, %s1073_s11 }
  0x23   : > { %p1076_p3 = pnand %p1075_p2, %p1074_p1  ;;  %p1081_p8 = por %p1080_p7, %p1079_p5 }
  0x25   : > { %p1077_p4 = pneg %p1076_p3 }
  0x27   : > { %p1082_p10 = pnand %p1081_p8, %p1077_p4 }
  0x29   : > { %1085 = shalt.err (!%p1082_p10)
}
  0x2a   : > { %s1624_s29 = smov 128   ;;  %s1234_s5 = smov 8  }
  0x2b   : > { %993 = dma.hbm_to_vmem [thread:$0]  (!%p1319_p13), %s179_s8, 1024, %s181_s7, %s1330_s9, %s1624_s29, %s1624_s29, %s1234_s5  }
  0x2c   : > { %p211_p1 = scmp.lt.s32.totalorder %s1231_s15, 3  ;;  %s1634_s0 = sld [smem:[#allocation13_spill]] }
  0x2d   : > { %s148_s20 = scalar_lea.vmem [#allocation2], %s1317_s27  ;;  %s145_s4 = scalar_lea.sflag [#allocation3], %s144_s25 }
  0x2e   : > { %p1356_p3 = pnand %p936_p0, %p211_p1  ;;  %s157_s30 = sshll.u32 %s148_s20, 4  ;;  %s158_s30 = int_to_ptr.vmem [resolvable:$true] %s157_s30 }
  0x32   : > { %s154_s11 = scalar_lea.hbm %s1634_s0, %s1313_s26  ;;  %s1108_s10 = scalar_lea.hbm %s1634_s0, 128 }
  0x33   : > { %s155_s19 = sshll.u32 %s154_s11, 4  ;;  %s156_s19 = int_to_ptr.hbm [resolvable:$true] %s155_s19 }
  0x34   : > { %s1101_s1 = sshra.s32 %s156_s19, 4  ;;  %s1102_s1 = int_to_ptr.hbm [resolvable:$true] %s1101_s1 }
  0x35   : > { %s1103_s7 = scalar_lea.hbm %s1102_s1, 64  ;;  %p1109_p0 = scmp.lt.s32.totalorder %s1102_s1, %s1634_s0 }
  0x36   : > { %p1104_p4 = scmp.ne.s32.totalorder %s1102_s1, %s1103_s7  ;;  %p1110_p8 = scmp.lt.s32.totalorder %s1108_s10, %s1103_s7 }
  0x38   : > { %p1106_p5 = pnand %p1104_p4, %p1075_p2  ;;  %p1111_p10 = por %p1110_p8, %p1109_p0 }
  0x3a   : > { %p1107_p7 = pneg %p1106_p5 }
  0x3c   : > { %p1112_p1 = pnand %p1111_p10, %p1107_p7 }
  0x3e   : > { %1115 = shalt.err (!%p1112_p1)
}
  0x3f   : > { %s1636_s25 = smov 128   ;;  %s200_s6 = scalar_lea.hbm %s1622_s2, %s1313_s26 }
  0x40   : > { %990 = dma.hbm_to_vmem [thread:$0]  (!%p1319_p13), %s156_s19, 1024, %s158_s30, %s145_s4, %s1636_s25, %s1636_s25, %s1234_s5  }
  0x41   : > { %s194_s21 = scalar_lea.vmem [#allocation7], %s1317_s27  ;;  %s201_s1 = sshll.u32 %s200_s6, 4  ;;  %s202_s1 = int_to_ptr.hbm [resolvable:$true] %s201_s1 }
  0x42   : > { %s203_s29 = sshll.u32 %s194_s21, 4  ;;  %s1131_s7 = sshra.s32 %s202_s1, 4  ;;  %s204_s29 = int_to_ptr.vmem [resolvable:$true] %s203_s29  ;;  %s1132_s7 = int_to_ptr.hbm [resolvable:$true] %s1131_s7 }
  0x43   : > { %s1133_s10 = scalar_lea.hbm %s1132_s7, 64  ;;  %s1138_s19 = scalar_lea.hbm %s1622_s2, 128 }
  0x44   : > { %p1134_p4 = scmp.ne.s32.totalorder %s1132_s7, %s1133_s10  ;;  %p1139_p0 = scmp.lt.s32.totalorder %s1132_s7, %s1622_s2 }
  0x45   : > { %p1140_p8 = scmp.lt.s32.totalorder %s1138_s19, %s1133_s10 }
  0x46   : > { %p1136_p5 = pnand %p1134_p4, %p1075_p2 }
  0x47   : > { %p1141_p10 = por %p1140_p8, %p1139_p0 }
  0x48   : > { %p1137_p7 = pneg %p1136_p5 }
  0x4a   : > { %p1142_p1 = pnand %p1141_p10, %p1137_p7 }
  0x4c   : > { %1145 = shalt.err (!%p1142_p1)
}
  0x4d   : > { %996 = dma.hbm_to_vmem [thread:$0]  (!%p1319_p13), %s202_s1, 1024, %s204_s29, %s1330_s9, %s1636_s25, %s1636_s25, %s1234_s5  }
  0x4e   : > { %215 = sbr.rel (%p1356_p3) target bundleno = 651 (0x28b), region = 32  ;;  %s1400_s0 = sand.u32 (!%p1356_p3), 1, %s1223_s13  }
  0x4f   : > { %s1403_s21 = sshll.u32 (!%p1356_p3), %s1400_s0, 6  ;;  %s218_s26 = scalar_lea.sflag (!%p1356_p3), [#allocation3], %s1400_s0 }
  0x50   : > { %s1407_s27 = scalar_lea.vmem (!%p1356_p3), [#allocation2], %s1403_s21 }
  0x53   : > { %1206 = dma.done.wait (%p1296_p6), %s218_s26, 1024  }
  0x54   : > { %1208 = vsyncadd (%p1296_p6), %s218_s26, 4294966272  ;;  %s227_s28 = sand.u32 1, %s1278_s16   ;;  %s231_s5 = scalar_lea.vmem [#allocation5], %s1403_s21 }
  0x55   : > { %s228_s9 = scalar_lea.sflag [#allocation6], %s227_s28 }
  0x56   : > { %1210 = dma.done.wait (%p1296_p6), %s228_s9, 2048  }
  0x57   : > { %1212 = vsyncadd (%p1296_p6), %s228_s9, 4294965248  ;;  %vm303_vm0 = vcmask 261120   ;;  %v288_v0 = vld [vmem:[%s231_s5 + $0x8] sm:$0xff]  ;;  %v287_v2 = vld [vmem:[%s231_s5] sm:$0xff]  ;;  %v452_v16 = vlaneseq  ;;  %vm471_vm2 = vcmask 130048   ;;  %s241_s22 = scalar_lea.vmem [#allocation7], %s1403_s21 }
  0x58   : > { %v292_v1 = vld [vmem:[%s231_s5 + $0x28] sm:$0xff]  ;;  %941 = vmatpush.xpose.msk.msra.mxu0 %vm303_vm0, %v288_v0  ;;  %v291_v3 = vld [vmem:[%s231_s5 + $0x20] sm:$0xff]  ;;  %v290_v4 = vld [vmem:[%s231_s5 + $0x18] sm:$0xff]  ;;  %s274_s17 = scalar_lea.vmem [#allocation8], %s1403_s21  ;;  %s978_s25 = sshll.u32 %s1278_s16, 6 }
  0x59   : > { %949 = vmatpush.xpose.msk.msra.mxu2 %vm303_vm0, %v292_v1  ;;  %v294_v5 = vld [vmem:[%s231_s5 + $0x38] sm:$0xff]  ;;  %945 = vmatpush.xpose.msk.msra.mxu1 %vm303_vm0, %v290_v4  ;;  %v289_v6 = vld [vmem:[%s231_s5 + $0x10] sm:$0xff]  ;;  %v279_v8 = vld [vmem:[%s1407_s27] sm:$0xff]  ;;  %v453_v17 = vshrl.u32 %v452_v16, 7  ;;  %v456_v18 = vand.u32 127, %v452_v16  ;;  %s801_s6 = scalar_lea.hbm %s1623_s3, %s978_s25  ;;  %s802_s29 = sshll.u32 %s274_s17, 4  ;;  %s803_s29 = int_to_ptr.vmem [resolvable:$true] %s802_s29 }
  0x5a   : > { %953 = vmatpush.xpose.msk.msra.mxu3 %vm303_vm0, %v294_v5  ;;  %v293_v7 = vld [vmem:[%s231_s5 + $0x30] sm:$0xff]  ;;  %v283_v9 = vld [vmem:[%s1407_s27 + $0x20] sm:$0xff]  ;;  %v284_v12 = vld [vmem:[%s1407_s27 + $0x28] sm:$0xff]  ;;  %s804_s1 = sshll.u32 %s801_s6, 4  ;;  %s789_s16 = scalar_lea.sflag [#allocation4], %s1400_s0  ;;  %s805_s1 = int_to_ptr.hbm [resolvable:$true] %s804_s1 }
  0x5b   : > { %v281_v10 = vld [vmem:[%s1407_s27 + $0x10] sm:$0xff]  ;;  %v280_v13 = vld [vmem:[%s1407_s27 + $0x8] sm:$0xff]  ;;  %v282_v14 = vld [vmem:[%s1407_s27 + $0x18] sm:$0xff]  ;;  %vm457_vm1 = vcmp.le.s32.totalorder %v456_v18, %v453_v17  ;;  %v454_v34 = vadd.s32 8, %v453_v17  ;;  %s1175_s7 = sshra.s32 %s805_s1, 4  ;;  %s1181_s30 = scalar_lea.hbm %s1623_s3, 128  ;;  %s1176_s7 = int_to_ptr.hbm [resolvable:$true] %s1175_s7 }
  0x5c   : > { %942 = vmatpush.xpose.msk.msra.mxu0 %vm303_vm0, %v287_v2  ;;  %v285_v11 = vld [vmem:[%s1407_s27 + $0x30] sm:$0xff]  ;;  %v286_v15 = vld [vmem:[%s1407_s27 + $0x38] sm:$0xff]  ;;  %s1177_s10 = scalar_lea.hbm %s1176_s7, 64  ;;  %p1182_p3 = scmp.lt.s32.totalorder %s1176_s7, %s1623_s3 }
  0x5d   : > { %950 = vmatpush.xpose.msk.msra.mxu2 %vm303_vm0, %v291_v3  ;;  %946 = vmatpush.xpose.msk.msra.mxu1 %vm303_vm0, %v289_v6  ;;  %vm458_vm3 = vcmp.le.s32.totalorder %v456_v18, %v454_v34  ;;  %v298_v34 = vld [vmem:[%s241_s22 + $0x18] sm:$0xff]  ;;  %p1178_p6 = scmp.ne.s32.totalorder %s1176_s7, %s1177_s10  ;;  %p1183_p4 = scmp.lt.s32.totalorder %s1181_s30, %s1177_s10 }
  0x5e   : > { %954 = vmatpush.xpose.msk.msra.mxu3 %vm303_vm0, %v293_v7 }
  0x5f   : > { %943 = vmatmul.msk.f32.vlgmr.msra.gmra.mxu0 %vm303_vm0, %v279_v8  ;;  %p1179_p13 = pnand %p1178_p6, %p1303_p11  ;;  %p1184_p5 = por %p1183_p4, %p1182_p3 }
  0x60   : > { %951 = vmatmul.msk.f32.vlgmr.msra.gmra.mxu2 %vm303_vm0, %v283_v9  ;;  %947 = vmatmul.msk.f32.vlgmr.msra.gmra.mxu1 %vm303_vm0, %v281_v10 }
  0x61   : > { %955 = vmatmul.msk.f32.vlgmr.msra.gmra.mxu3 %vm303_vm0, %v285_v11  ;;  %713 = vmatpush.msrb.mxu1 %v298_v34  ;;  %p1180_p2 = pneg %p1179_p13 }
  0x63   : > { %p1185_p7 = pnand %p1184_p5, %p1180_p2 }
  0x67   : > { %944 = vmatmul.msk.f32.gmra.mxu0 %vm303_vm0, %v280_v13 }
  0x68   : > { %952 = vmatmul.msk.f32.gmra.mxu2 %vm303_vm0, %v284_v12  ;;  %948 = vmatmul.msk.f32.gmra.mxu1 %vm303_vm0, %v282_v14 }
  0x69   : > { %956 = vmatmul.msk.f32.gmra.mxu3 %vm303_vm0, %v286_v15 }
  0xdc   : > { %v333_v19 = vpop.f32.mrf.mxu0 }
  0xdd   : > { %v444_v20 = vmul.f32 0.17677669, %v333_v19  ;;  %v368_v21 = vpop.f32.mrf.mxu1 }
  0xde   : > { %v446_v23 = vmul.f32 0.17677669, %v368_v21 }
  0xdf   : > { %v463_v22 = vsel %vm457_vm1, %v444_v20, -2.3819763e+38 }
  0xe0   : > { %v472_v24 = vsel %vm471_vm2, %v463_v22, -inf  ;;  %v465_v27 = vsel %vm457_vm1, %v446_v23, -2.3819763e+38 }
  0xe1   : > { %473 = vmax.xlane.f32.xlu1 %v472_v24  ;;  %v478_v32 = vsel %vm471_vm2, %v465_v27, -inf }
  0xe3   : > { %v403_v25 = vpop.f32.mrf.mxu2 }
  0xe4   : > { %v448_v26 = vmul.f32 0.17677669, %v403_v25  ;;  %v438_v28 = vpop.f32.mrf.mxu3  ;;  %v336_v38 = vpop.f32.mrf.mxu0 }
  0xe5   : > { %v450_v30 = vmul.f32 0.17677669, %v438_v28  ;;  %v371_v33 = vpop.f32.mrf.mxu1  ;;  %v445_v44 = vmul.f32 0.17677669, %v336_v38  ;;  %v296_v28 = vld [vmem:[%s241_s22 + $0x8] sm:$0xff] }
  0xe6   : > { %v467_v29 = vsel %vm457_vm1, %v448_v26, -2.3819763e+38  ;;  %v447_v35 = vmul.f32 0.17677669, %v371_v33  ;;  %684 = vmatpush.msrb.mxu0 %v296_v28 }
  0xe7   : > { %v484_v31 = vsel %vm471_vm2, %v467_v29, -inf  ;;  %v469_v36 = vsel %vm457_vm1, %v450_v30, -2.3819763e+38  ;;  %v464_v49 = vsel %vm458_vm3, %v445_v44, -2.3819763e+38  ;;  %v300_v30 = vld [vmem:[%s241_s22 + $0x28] sm:$0xff] }
  0xe8   : > { %485 = vmax.xlane.f32.xlu0 %v484_v31  ;;  %v466_v40 = vsel %vm458_vm3, %v447_v35, -2.3819763e+38  ;;  %v490_v41 = vsel %vm471_vm2, %v469_v36, -inf  ;;  %v475_v51 = vsel %vm471_vm2, %v464_v49, -inf  ;;  %742 = vmatpush.msrb.mxu2 %v300_v30  ;;  %v302_v31 = vld [vmem:[%s241_s22 + $0x38] sm:$0xff]  ;;  %v301_v35 = vld [vmem:[%s241_s22 + $0x30] sm:$0xff] }
  0xe9   : > { %479 = vmax.xlane.f32.xlu1 %v478_v32  ;;  %v481_v47 = vsel %vm471_vm2, %v466_v40, -inf  ;;  %v299_v32 = vld [vmem:[%s241_s22 + $0x20] sm:$0xff]  ;;  %771 = vmatpush.msrb.mxu3 %v302_v31 }
  0xea   : > { %743 = vmatpush.msrb.mxu2 %v299_v32 }
  0xeb   : > { %v406_v37 = vpop.f32.mrf.mxu2  ;;  %772 = vmatpush.msrb.mxu3 %v301_v35 }
  0xec   : > { %v449_v39 = vmul.f32 0.17677669, %v406_v37  ;;  %v441_v42 = vpop.f32.mrf.mxu3 }
  0xed   : > { %v451_v45 = vmul.f32 0.17677669, %v441_v42 }
  0xee   : > { %v468_v43 = vsel %vm458_vm3, %v449_v39, -2.3819763e+38 }
  0xef   : > { %v487_v46 = vsel %vm471_vm2, %v468_v43, -inf  ;;  %v470_v48 = vsel %vm458_vm3, %v451_v45, -2.3819763e+38 }
  0xf0   : > { %491 = vmax.xlane.f32.xlu0 %v490_v41  ;;  %488 = vmax.xlane.f32.xlu2 %v487_v46  ;;  %v493_v50 = vsel %vm471_vm2, %v470_v48, -inf }
  0xf1   : > { %482 = vmax.xlane.f32.xlu1 %v481_v47 }
  0xf8   : > { %494 = vmax.xlane.f32.xlu2 %v493_v50  ;;  %476 = vmax.xlane.f32.xlu0 %v475_v51 }
 0x154   : > { %v474_v52 = vpop.xlane.xlu1 %473 }
 0x155   : > { %v496_v53 = vsub.f32 %v463_v22, %v474_v52 }
 0x157   : > { %v504_v54 = vmul.f32 1.442695, %v496_v53 }
 0x159   : > { %1039 = vpow2.f32 %v504_v54 }
 0x15b   : > { %v486_v55 = vpop.xlane.xlu0 %485 }
 0x15c   : > { %v500_v56 = vsub.f32 %v467_v29, %v486_v55  ;;  %v480_v57 = vpop.xlane.xlu1 %479  ;;  %v295_v29 = vld [vmem:[%s241_s22] sm:$0xff] }
 0x15d   : > { %v498_v59 = vsub.f32 %v465_v27, %v480_v57  ;;  %685 = vmatpush.msrb.mxu0 %v295_v29 }
 0x15e   : > { %v512_v58 = vmul.f32 1.442695, %v500_v56 }
 0x15f   : > { %v1455_v60 = vpop.eup %1039  ;;  %v508_v62 = vmul.f32 1.442695, %v498_v59 }
 0x160   : > { %1041 = vpow2.f32 %v512_v58  ;;  %v520_v61 = vsel %vm471_vm2, %v1455_v60, 0.0 }
 0x161   : > { %521 = vadd.xlane.f32.xlu1 %v520_v61  ;;  %1043 = vpow2.f32 %v508_v62 }
 0x163   : > { %v492_v63 = vpop.xlane.xlu0 %491  ;;  %v489_v0 = vpop.xlane.xlu2 %488 }
 0x164   : > { %v502_v1 = vsub.f32 %v469_v36, %v492_v63  ;;  %v501_v4 = vsub.f32 %v468_v43, %v489_v0  ;;  %v483_v7 = vpop.xlane.xlu1 %482  ;;  %v297_v36 = vld [vmem:[%s241_s22 + $0x10] sm:$0xff] }
 0x165   : > { %v499_v14 = vsub.f32 %v466_v40, %v483_v7  ;;  %714 = vmatpush.msrb.mxu1 %v297_v36 }
 0x166   : > { %v1459_v2 = vpop.eup %1041  ;;  %v516_v3 = vmul.f32 1.442695, %v502_v1  ;;  %v514_v6 = vmul.f32 1.442695, %v501_v4 }
 0x167   : > { %v532_v5 = vsel %vm471_vm2, %v1459_v2, 0.0  ;;  %v1463_v10 = vpop.eup %1043  ;;  %v510_v19 = vmul.f32 1.442695, %v499_v14 }
 0x168   : > { %1045 = vpow2.f32 %v516_v3  ;;  %533 = vadd.xlane.f32.xlu2 %v532_v5  ;;  %v526_v17 = vsel %vm471_vm2, %v1463_v10, 0.0 }
 0x169   : > { %1047 = vpow2.f32 %v514_v6 }
 0x16b   : > { %v495_v8 = vpop.xlane.xlu2 %494  ;;  %v477_v9 = vpop.xlane.xlu0 %476 }
 0x16c   : > { %v503_v11 = vsub.f32 %v470_v48, %v495_v8  ;;  %v497_v12 = vsub.f32 %v464_v49, %v477_v9 }
 0x16e   : > { %v1465_v13 = vpop.eup %1045  ;;  %v518_v15 = vmul.f32 1.442695, %v503_v11  ;;  %v506_v16 = vmul.f32 1.442695, %v497_v12 }
 0x16f   : > { %v538_v18 = vsel %vm471_vm2, %v1465_v13, 0.0  ;;  %v1471_v20 = vpop.eup %1047 }
 0x170   : > { %1049 = vpow2.f32 %v518_v15  ;;  %527 = vadd.xlane.f32.xlu2 %v526_v17  ;;  %539 = vadd.xlane.f32.xlu0 %v538_v18  ;;  %v535_v24 = vsel %vm471_vm2, %v1471_v20, 0.0 }
 0x171   : > { %1051 = vpow2.f32 %v506_v16 }
 0x172   : > { %1053 = vpow2.f32 %v510_v19 }
 0x176   : > { %v1473_v21 = vpop.eup %1049 }
 0x177   : > { %v1475_v22 = vpop.eup %1051  ;;  %v541_v23 = vsel %vm471_vm2, %v1473_v21, 0.0 }
 0x178   : > { %542 = vadd.xlane.f32.xlu1 %v541_v23  ;;  %536 = vadd.xlane.f32.xlu0 %v535_v24  ;;  %v523_v25 = vsel %vm471_vm2, %v1475_v22, 0.0  ;;  %v1483_v26 = vpop.eup %1053 }
 0x179   : > { %524 = vadd.xlane.f32.xlu2 %v523_v25  ;;  %v529_v27 = vsel %vm471_vm2, %v1483_v26, 0.0 }
 0x180   : > { %530 = vadd.xlane.f32.xlu0 %v529_v27 }
 0x1d4   : > { %v522_v33 = vpop.xlane.xlu1 %521 }
 0x1d5   : > { %1055 = vrcp.f32 %v522_v33  ;;  %v555_v42 = vand.u32 2147483648, %v522_v33  ;;  %v553_v44 = vand.u32 2147483647, %v522_v33  ;;  %vm549_vm5 = vweird.f32 %v522_v33 }
 0x1d7   : > { %v556_v49 = vor.u32 1.1754944e-38, %v555_v42  ;;  %vm554_vm7 = vcmp.eq.f32.partialorder %v553_v44, 8.507059e+37 }
 0x1db   : > { %v534_v37 = vpop.xlane.xlu2 %533  ;;  %v1056_v38 = vpop.eup %1055 }
 0x1dc   : > { %1057 = vrcp.f32 %v534_v37  ;;  %v545_v39 = vmul.f32 %v1056_v38, %v522_v33  ;;  %vm550_vm4 = vweird.f32 %v1056_v38  ;;  %v615_v57 = vand.u32 2147483648, %v534_v37 }
 0x1dd   : > { %vm551_vm6 = vmor %vm549_vm5, %vm550_vm4  ;;  %vm609_vm9 = vweird.f32 %v534_v37  ;;  %v613_v63 = vand.u32 2147483647, %v534_v37 }
 0x1de   : > { %v546_v40 = vsub.f32 1.0, %v545_v39  ;;  %v616_v6 = vor.u32 1.1754944e-38, %v615_v57 }
 0x1df   : > { %vm614_vm12 = vcmp.eq.f32.partialorder %v613_v63, 8.507059e+37 }
 0x1e0   : > { %v547_v41 = vmul.f32 %v1056_v38, %v546_v40 }
 0x1e2   : > { %v1058_v43 = vpop.eup %1057  ;;  %v548_v45 = vadd.f32 %v1056_v38, %v547_v41 }
 0x1e3   : > { %v605_v46 = vmul.f32 %v1058_v43, %v534_v37  ;;  %v528_v47 = vpop.xlane.xlu2 %527  ;;  %v1488_v48 = vpop.xlane.xlu0 %539  ;;  %vm610_vm8 = vweird.f32 %v1058_v43 }
 0x1e4   : > { %1059 = vrcp.f32 %v528_v47  ;;  %v552_v51 = vsel %vm551_vm6, %v1056_v38, %v548_v45  ;;  %vm1501_vm10 = vmor %vm609_vm9, %vm610_vm8  ;;  %v583_v4 = vand.u32 2147483647, %v528_v47  ;;  %v585_v5 = vand.u32 2147483648, %v528_v47 }
 0x1e5   : > { %v606_v50 = vsub.f32 1.0, %v605_v46  ;;  %1061 = vrcp.f32 %v1488_v48  ;;  %v557_v53 = vsel %vm554_vm7, %v556_v49, %v552_v51  ;;  %v643_v8 = vand.u32 2147483647, %v1488_v48 }
 0x1e6   : > { %v558_v54 = vmul.f32 %v1455_v60, %v557_v53  ;;  %v645_v12 = vand.u32 2147483648, %v1488_v48  ;;  %vm579_vm13 = vweird.f32 %v528_v47  ;;  %vm639_vm14 = vweird.f32 %v1488_v48 }
 0x1e7   : > { %v607_v52 = vmul.f32 %v1058_v43, %v606_v50  ;;  %vm1512_vm15 = vcmp.eq.f32.partialorder %v583_v4, 8.507059e+37  ;;  %v586_v17 = vor.u32 1.1754944e-38, %v585_v5  ;;  %vm1520_vm4 = vcmp.eq.f32.partialorder %v643_v8, 8.507059e+37 }
 0x1e8   : > { %957 = vmatmul.msk.f32.vlgmr.msrb.gmra.mxu0 %vm471_vm2, %v558_v54  ;;  %v646_v29 = vor.u32 1.1754944e-38, %v645_v12 }
 0x1e9   : > { %v608_v56 = vadd.f32 %v1058_v43, %v607_v52 }
 0x1ea   : > { %v1060_v55 = vpop.eup %1059 }
 0x1eb   : > { %v1062_v58 = vpop.eup %1061  ;;  %v575_v59 = vmul.f32 %v1060_v55, %v528_v47  ;;  %v1493_v61 = vpop.xlane.xlu1 %542  ;;  %v612_v9 = vsel %vm1501_vm10, %v1058_v43, %v608_v56  ;;  %vm580_vm11 = vweird.f32 %v1060_v55 }
 0x1ec   : > { %v1495_v62 = vpop.xlane.xlu0 %536  ;;  %v635_v0 = vmul.f32 %v1062_v58, %v1488_v48  ;;  %1063 = vrcp.f32 %v1493_v61  ;;  %v1499_v1 = vpop.xlane.xlu2 %524  ;;  %v617_v18 = vsel %vm614_vm12, %v616_v6, %v612_v9  ;;  %vm1516_vm1 = vmor %vm579_vm13, %vm580_vm11  ;;  %vm640_vm3 = vweird.f32 %v1062_v58 }
 0x1ed   : > { %v576_v3 = vsub.f32 1.0, %v575_v59  ;;  %1065 = vrcp.f32 %v1499_v1  ;;  %v618_v27 = vmul.f32 %v1459_v2, %v617_v18  ;;  %vm654_vm5 = vweird.f32 %v1493_v61  ;;  %vm641_vm6 = vmor %vm639_vm14, %vm640_vm3 }
 0x1ee   : > { %v636_v7 = vsub.f32 1.0, %v635_v0  ;;  %1067 = vrcp.f32 %v1495_v62  ;;  %v658_v33 = vand.u32 2147483647, %v1493_v61  ;;  %v660_v34 = vand.u32 2147483648, %v1493_v61 }
 0x1ef   : > { %v577_v11 = vmul.f32 %v1060_v55, %v576_v3  ;;  %961 = vmatmul.msk.f32.vlgmr.msrb.gmra.mxu2 %vm471_vm2, %v618_v27  ;;  %vm564_vm7 = vweird.f32 %v1499_v1  ;;  %v568_v37 = vand.u32 2147483647, %v1499_v1  ;;  %v570_v44 = vand.u32 2147483648, %v1499_v1 }
 0x1f0   : > { %v637_v14 = vmul.f32 %v1062_v58, %v636_v7  ;;  %vm1550_vm10 = vcmp.eq.f32.partialorder %v658_v33, 8.507059e+37  ;;  %v630_v51 = vand.u32 2147483648, %v1495_v62 }
 0x1f1   : > { %v578_v15 = vadd.f32 %v1060_v55, %v577_v11  ;;  %vm569_vm14 = vcmp.eq.f32.partialorder %v568_v37, 8.507059e+37 }
 0x1f2   : > { %v1064_v19 = vpop.eup %1063  ;;  %v638_v24 = vadd.f32 %v1062_v58, %v637_v14  ;;  %v631_v63 = vor.u32 1.1754944e-38, %v630_v51 }
 0x1f3   : > { %v1066_v28 = vpop.eup %1065  ;;  %v650_v30 = vmul.f32 %v1064_v19, %v1493_v61  ;;  %v582_v32 = vsel %vm1516_vm1, %v1060_v55, %v578_v15  ;;  %vm655_vm8 = vweird.f32 %v1064_v19  ;;  %v628_v55 = vand.u32 2147483647, %v1495_v62 }
 0x1f4   : > { %v1527_v31 = vpop.xlane.xlu0 %530  ;;  %v560_v35 = vmul.f32 %v1066_v28, %v1499_v1  ;;  %v1068_v2 = vpop.eup %1067  ;;  %v587_v38 = vsel %vm1512_vm15, %v586_v17, %v582_v32  ;;  %v642_v42 = vsel %vm641_vm6, %v1062_v58, %v638_v24  ;;  %vm565_vm9 = vweird.f32 %v1066_v28  ;;  %vm656_vm11 = vmor %vm654_vm5, %vm655_vm8 }
 0x1f5   : > { %1069 = vrcp.f32 %v1527_v31  ;;  %v651_v36 = vsub.f32 1.0, %v650_v30  ;;  %v620_v40 = vmul.f32 %v1068_v2, %v1495_v62  ;;  %v588_v41 = vmul.f32 %v1463_v10, %v587_v38  ;;  %vm566_vm13 = vmor %vm564_vm7, %vm565_vm9 }
 0x1f6   : > { %v561_v39 = vsub.f32 1.0, %v560_v35  ;;  %v647_v45 = vsel %vm1520_vm4, %v646_v29, %v642_v42  ;;  %v661_v10 = vor.u32 1.1754944e-38, %v660_v34  ;;  %vm625_vm12 = vweird.f32 %v1068_v2 }
 0x1f7   : > { %v652_v43 = vmul.f32 %v1064_v19, %v651_v36  ;;  %v621_v47 = vsub.f32 1.0, %v620_v40  ;;  %959 = vmatmul.msk.f32.vlgmr.msrb.gmra.mxu1 %vm471_vm2, %v588_v41  ;;  %v648_v48 = vmul.f32 %v1465_v13, %v647_v45  ;;  %v571_v13 = vor.u32 1.1754944e-38, %v570_v44 }
 0x1f8   : > { %v562_v46 = vmul.f32 %v1066_v28, %v561_v39  ;;  %vm624_vm15 = vweird.f32 %v1495_v62  ;;  %v600_v60 = vand.u32 2147483648, %v1527_v31  ;;  %vm629_vm3 = vcmp.eq.f32.partialorder %v628_v55, 8.507059e+37 }
 0x1f9   : > { %v653_v49 = vadd.f32 %v1064_v19, %v652_v43  ;;  %v622_v54 = vmul.f32 %v1068_v2, %v621_v47  ;;  %963 = vmatmul.msk.f32.vlgmr.msrb.gmra.mxu3 %vm471_vm2, %v648_v48  ;;  %vm626_vm1 = vmor %vm624_vm15, %vm625_vm12  ;;  %v598_v62 = vand.u32 2147483647, %v1527_v31  ;;  %vm594_vm5 = vweird.f32 %v1527_v31 }
 0x1fa   : > { %v563_v53 = vadd.f32 %v1066_v28, %v562_v46 }
 0x1fb   : > { %v1070_v52 = vpop.eup %1069  ;;  %v657_v57 = vsel %vm656_vm11, %v1064_v19, %v653_v49  ;;  %v623_v59 = vadd.f32 %v1068_v2, %v622_v54  ;;  %vm599_vm7 = vcmp.eq.f32.partialorder %v598_v62, 8.507059e+37 }
 0x1fc   : > { %v590_v56 = vmul.f32 %v1070_v52, %v1527_v31  ;;  %v567_v58 = vsel %vm566_vm13, %v1066_v28, %v563_v53  ;;  %v662_v61 = vsel %vm1550_vm10, %v661_v10, %v657_v57  ;;  %vm595_vm4 = vweird.f32 %v1070_v52 }
 0x1fd   : > { %v572_v3 = vsel %vm569_vm14, %v571_v13, %v567_v58  ;;  %v627_v4 = vsel %vm626_vm1, %v1068_v2, %v623_v59  ;;  %v663_v5 = vmul.f32 %v1473_v21, %v662_v61  ;;  %vm596_vm6 = vmor %vm594_vm5, %vm595_vm4 }
 0x1fe   : > { %v591_v0 = vsub.f32 1.0, %v590_v56  ;;  %v573_v1 = vmul.f32 %v1475_v22, %v572_v3  ;;  %v632_v7 = vsel %vm629_vm3, %v631_v63, %v627_v4  ;;  %v601_v22 = vor.u32 1.1754944e-38, %v600_v60 }
 0x1ff   : > { %v633_v8 = vmul.f32 %v1471_v20, %v632_v7 }
 0x200   : > { %v592_v6 = vmul.f32 %v1070_v52, %v591_v0  ;;  %958 = vmatmul.msk.f32.gmra.mxu0 %vm471_vm2, %v573_v1 }
 0x201   : > { %962 = vmatmul.msk.f32.gmra.mxu2 %vm471_vm2, %v633_v8  ;;  %964 = vmatmul.msk.f32.gmra.mxu3 %vm471_vm2, %v663_v5 }
 0x202   : > { %v593_v9 = vadd.f32 %v1070_v52, %v592_v6 }
 0x204   : > { %v597_v21 = vsel %vm596_vm6, %v1070_v52, %v593_v9 }
 0x205   : > { %v602_v11 = vsel %vm599_vm7, %v601_v22, %v597_v21 }
 0x206   : > { %v603_v12 = vmul.f32 %v1483_v26, %v602_v11 }
 0x208   : > { %960 = vmatmul.msk.f32.gmra.mxu1 %vm471_vm2, %v603_v12 }
 0x265   : > { %v687_v14 = vpop.f32.mrf.mxu0 }
 0x266   : > { %780 = vst.msk [vmem:[%s274_s17] sm:$0xff] %vm303_vm0, %v687_v14 }
 0x272   : > { %v745_v15 = vpop.f32.mrf.mxu2 }
 0x273   : > { %784 = vst.msk [vmem:[%s274_s17 + $0x20] sm:$0xff] %vm303_vm0, %v745_v15 }
 0x274   : > { %v716_v20 = vpop.f32.mrf.mxu1 }
 0x275   : > { %782 = vst.msk [vmem:[%s274_s17 + $0x10] sm:$0xff] %vm303_vm0, %v716_v20 }
 0x27c   : > { %v774_v16 = vpop.f32.mrf.mxu3 }
 0x27d   : > { %v690_v17 = vpop.f32.mrf.mxu0  ;;  %786 = vst.msk [vmem:[%s274_s17 + $0x30] sm:$0xff] %vm303_vm0, %v774_v16 }
 0x27e   : > { %781 = vst.msk [vmem:[%s274_s17 + $0x8] sm:$0xff] %vm303_vm0, %v690_v17 }
 0x284   : > { %v748_v18 = vpop.f32.mrf.mxu2  ;;  %v777_v19 = vpop.f32.mrf.mxu3 }
 0x285   : > { %v719_v26 = vpop.f32.mrf.mxu1  ;;  %785 = vst.msk [vmem:[%s274_s17 + $0x28] sm:$0xff] %vm303_vm0, %v748_v18 }
 0x286   : > { %783 = vst.msk [vmem:[%s274_s17 + $0x18] sm:$0xff] %vm303_vm0, %v719_v26 }
 0x287   : > { %787 = vst.msk [vmem:[%s274_s17 + $0x38] sm:$0xff] %vm303_vm0, %v777_v19 }
 0x288   : > { %1188 = shalt.err (!%p1185_p7)
}
 0x289   : > { %s1235_s0 = smov 128   ;;  %s1236_s26 = smov 8  }
 0x28a   : > { %985 = dma.vmem_to_hbm [thread:$0]  (%p1303_p11), %s803_s29, 1024, %s805_s1, %s789_s16, %s1235_s0, %s1235_s0, %s1236_s26  }
 0x28b PF: > { %s819_s27 = sand.u32 1, %s1219_s12   ;;  %p998_p0 = pnand %p923_p9, %p1307_p12 }
 0x28c   : > { %s820_s28 = scalar_lea.sflag [#allocation4], %s819_s27 }
 0x28d   : > { %p999_p8 = pneg %p998_p0 }
 0x28f   : > { %1214 = dma.done.wait (%p999_p8), %s820_s28, 1024  }
 0x290   : > { %1216 = vsyncadd (%p999_p8), %s820_s28, 4294966272  ;;  %s1647_s9 = sld [smem:[#allocation12_spill]]  ;;  %p19_p10 = scmp.ge.s32.totalorder %s1282_s18, 4  }
 0x291   : > { %s1648_s12 = smov %s1223_s13  ;;  %s1649_s13 = smov %s1227_s14 }
 0x292   : > { %s1651_s15 = smov %s1282_s18  ;;  %21 = sbr.rel (!%p19_p10) target bundleno = 10 (0xa), region = 101 }
 0x296   : > { %s1650_s14 = smov %s1647_s9 }
 0x297   :  { %826 = vsyncpa [#allocation3], 1 }
 0x298   :  { %828 = vsyncpa [#allocation3 + $0x1], 1 }
 0x299   :  { %829 = vsyncpa [#allocation6], 1 }
 0x29a   :  { %831 = vsyncpa [#allocation6 + $0x1], 1 }
 0x29b   :  { %832 = vsyncpa [#allocation4], 1 }
 0x29c   :  { %834 = vsyncpa [#allocation4 + $0x1], 1 }

</bundles_post_ra>
